<compile_context>
chip_gen: v7x
topology: tpu7x:2x2x1
jax: 0.10.0
libtpu: 0.0.40
codegen_flags: <defaults>
</compile_context>

<pallas_src>
import jax
import jax.numpy as jnp
from jax.experimental import pallas as pl
from jax.experimental.pallas import tpu as pltpu


# -----------------------------------------------------------------------------
# Small, module-consistent configuration (the real module uses
# input_dim=(202, 768), bottleneck=512, output_dim=(1, 256, 7, 7)).
# Toy shapes keep every lane dimension a multiple of 128.
# -----------------------------------------------------------------------------
BATCH = 2
SEQ_IN = 6                # raw FLAVA multimodal sequence length (< target -> pad)
TARGET_LEN = 8            # ensure_fixed_shape target_length      (202 in module)
FEAT_DIM = 128            # FLAVA hidden dim                      (768 in module)
BOTTLENECK = 128          # ConvertLayer bottleneck_dim           (512 in module)
OUT_DIM = (1, 32, 4, 4)   # ConvertLayer output_dim               ((1,256,7,7) in module)

INPUT_SIZE = TARGET_LEN * FEAT_DIM                        # 202*768 in module
OUTPUT_SIZE = OUT_DIM[0] * OUT_DIM[1] * OUT_DIM[2] * OUT_DIM[3]

TK = 256                  # K (reduction) tile; at production scale use >= 2048
K_TILES = INPUT_SIZE // TK
SUBLANE = 8               # pad batch rows up to a multiple of this


# -----------------------------------------------------------------------------
# Pallas kernel: K-tiled ConvertLayer MLP
#   acc  += x_tile @ W1_tile          (streamed over K, f32 accumulator)
#   out   = (acc + b1) @ W2 + b2      (on the last K step; W2 resident)
# -----------------------------------------------------------------------------
def convert_layer_kernel(kb_ref, nk_ref, x_ref, w1_ref, b1_ref, w2_ref, b2_ref,
                         o_ref, acc_ref):
    del kb_ref  # only used by the index_maps
    k = pl.program_id(0)

    @pl.when(k == 0)
    def _zero_acc():
        acc_ref[...] = jnp.zeros_like(acc_ref)

    # Skip K tiles that are entirely zero padding (their W1 DMA was already
    # skipped by clamping the block index in the index_map).
    @pl.when(k < nk_ref[0])
    def _accumulate():
        acc_ref[...] += jnp.dot(x_ref[...], w1_ref[...],
                                preferred_element_type=jnp.float32)

    @pl.when(k == pl.num_programs(0) - 1)
    def _finalize():
        h = acc_ref[...] + b1_ref[...]                     # f32 [Bp, BN]
        out = jnp.dot(h.astype(w2_ref.dtype), w2_ref[...],
                      preferred_element_type=jnp.float32) + b2_ref[...]
        o_ref[...] = out.astype(o_ref.dtype)


def convert_layer_pallas(x_flat, w1t, b1, w2t, b2, valid_k_tiles):
    """x_flat: [Bp, INPUT_SIZE] (bf16) -> [Bp, OUTPUT_SIZE] (f32)."""
    Bp = x_flat.shape[0]

    # Scalar-prefetch tables: per-step W1/x block index (clamped so padding
    # tiles re-use the previous block -> no DMA), and the number of valid tiles.
    kb_ids = jnp.minimum(jnp.arange(K_TILES, dtype=jnp.int32),
                         jnp.int32(valid_k_tiles - 1))
    nk = jnp.array([valid_k_tiles], dtype=jnp.int32)

    grid_spec = pltpu.PrefetchScalarGridSpec(
        num_scalar_prefetch=2,
        grid=(K_TILES,),
        in_specs=[
            # streamed over K (double buffered by the pipeline)
            pl.BlockSpec((Bp, TK), lambda k, kb, nk: (0, kb[k])),
            pl.BlockSpec((TK, BOTTLENECK), lambda k, kb, nk: (kb[k], 0)),
            # resident across the whole K loop (constant block index)
            pl.BlockSpec((1, BOTTLENECK), lambda k, kb, nk: (0, 0)),
            pl.BlockSpec((BOTTLENECK, OUTPUT_SIZE), lambda k, kb, nk: (0, 0)),
            pl.BlockSpec((1, OUTPUT_SIZE), lambda k, kb, nk: (0, 0)),
        ],
        out_specs=pl.BlockSpec((Bp, OUTPUT_SIZE), lambda k, kb, nk: (0, 0)),
        scratch_shapes=[pltpu.VMEM((Bp, BOTTLENECK), jnp.float32)],
    )

    return pl.pallas_call(
        convert_layer_kernel,
        out_shape=jax.ShapeDtypeStruct((Bp, OUTPUT_SIZE), jnp.float32),
        grid_spec=grid_spec,
        compiler_params=pltpu.CompilerParams(
            dimension_semantics=("arbitrary",),       # K is a reduction axis
            vmem_limit_bytes=32 * 1024 * 1024,        # safe on v5e/v6e/v7x
        ),
    )(kb_ids, nk, x_flat, w1t, b1, w2t, b2)


# -----------------------------------------------------------------------------
# Glue (plain JAX): ensure_fixed_shape + flatten + batch pad + reshape
# -----------------------------------------------------------------------------
def ensure_fixed_shape(x, target_length=TARGET_LEN):
    """Pad with zeros / truncate along the sequence axis.  x: [B, N, D]."""
    b, n, d = x.shape
    if n < target_length:
        pad = jnp.zeros((b, target_length - n, d), dtype=x.dtype)
        x = jnp.concatenate([x, pad], axis=1)
    elif n > target_length:
        x = x[:, :target_length, :]
    return x


def vl2pix_conv_path(multimodal_embeddings, w1t, b1, w2t, b2):
    """VL2Pix 'Conv' branch: ensure_fixed_shape -> unsqueeze(1) -> ConvertLayer.

    multimodal_embeddings: [B, N, D] float32
    returns: [B, 1, C, H, W]  (the convert_layer output fed to the decoder)
    """
    B, n, d = multimodal_embeddings.shape
    emb = ensure_fixed_shape(multimodal_embeddings, TARGET_LEN)   # [B, L, D]
    # torch: x.unsqueeze(1).view(B, -1) == row-major flatten of [B, L, D]
    x_flat = emb.reshape(B, -1).astype(jnp.bfloat16)              # [B, L*D]

    # Pad batch rows to a multiple of 8 so x/out blocks fill whole sublanes.
    Bp = ((B + SUBLANE - 1) // SUBLANE) * SUBLANE
    if Bp != B:
        x_flat = jnp.pad(x_flat, ((0, Bp - B), (0, 0)))

    # Number of K tiles that contain real (non-padded) sequence data.
    valid_len = min(n, TARGET_LEN) * d
    valid_k_tiles = max(1, min(-(-valid_len // TK), K_TILES))

    out = convert_layer_pallas(x_flat, w1t, b1, w2t, b2, valid_k_tiles)
    return out[:B].reshape(B, *OUT_DIM)                           # [B,1,C,H,W]


# -----------------------------------------------------------------------------
# Deterministic parameter init (mimics torch.nn.Linear default U(-k, k)).
# Weights are stored pre-transposed [in, out] and cast to bf16 (streamed);
# biases stay f32.
# -----------------------------------------------------------------------------
def init_linear(key, in_features, out_features):
    kw, kb = jax.random.split(key)
    bound = 1.0 / jnp.sqrt(in_features)
    w_t = jax.random.uniform(kw, (in_features, out_features),
                             minval=-bound, maxval=bound,
                             dtype=jnp.float32).astype(jnp.bfloat16)
    b = jax.random.uniform(kb, (1, out_features),
                           minval=-bound, maxval=bound, dtype=jnp.float32)
    return w_t, b


if __name__ == "__main__":
    root = jax.random.PRNGKey(0)
    k_x, k_l1, k_l2 = jax.random.split(root, 3)

    # Stand-in for flava_outputs.multimodal_embeddings: [B, N, D]
    embeddings = jax.random.normal(
        k_x, (BATCH, SEQ_IN, FEAT_DIM), dtype=jnp.float32)

    w1t, b1 = init_linear(k_l1, INPUT_SIZE, BOTTLENECK)    # bottleneck Linear
    w2t, b2 = init_linear(k_l2, BOTTLENECK, OUTPUT_SIZE)   # fc Linear

    out = vl2pix_conv_path(embeddings, w1t, b1, w2t, b2)
    out = jax.block_until_ready(out)

    # Pure-JAX reference with the same bf16 inputs / f32 accumulation.
    emb_ref = ensure_fixed_shape(embeddings, TARGET_LEN).reshape(
        BATCH, -1).astype(jnp.bfloat16)
    h_ref = jnp.dot(emb_ref, w1t, preferred_element_type=jnp.float32) + b1
    ref = (jnp.dot(h_ref.astype(jnp.bfloat16), w2t,
                   preferred_element_type=jnp.float32) + b2
           ).reshape(BATCH, *OUT_DIM)

    assert out.shape == (BATCH, *OUT_DIM), out.shape
    assert out.dtype == jnp.float32, out.dtype
    assert jnp.allclose(out, ref, atol=1e-2, rtol=1e-2), "mismatch vs reference"

    print("KERNEL_OK")
</pallas_src>

<mosaic_0001>
module attributes {stable_mosaic.version = 11 : i64} {
  func.func @convert_layer_kernel(%arg0: i32, %arg1: memref<4xi32, #tpu.memory_space<smem>>, %arg2: memref<1xi32, #tpu.memory_space<smem>>, %arg3: memref<8x256xbf16, #tpu.memory_space<vmem>>, %arg4: memref<256x128xbf16, #tpu.memory_space<vmem>>, %arg5: memref<1x128xf32, #tpu.memory_space<vmem>>, %arg6: memref<128x512xbf16, #tpu.memory_space<vmem>>, %arg7: memref<1x512xf32, #tpu.memory_space<vmem>>, %arg8: memref<8x512xf32, #tpu.memory_space<vmem>>, %arg9: memref<8x128xf32, #tpu.memory_space<vmem>>) attributes {dimension_semantics = [#tpu.dimension_semantics<arbitrary>], iteration_bounds = array<i64: 4>, scalar_prefetch = 2 : i64, scratch_operands = 1 : i64, tpu.core_type = #tpu.core_type<tc>, window_params = [{transform_indices = @transform_0, window_bounds = array<i64: 8, 256>}, {transform_indices = @transform_1, window_bounds = array<i64: 256, 128>}, {pipeline_mode = #tpu.pipeline_mode<synchronous>, transform_indices = @transform_2, window_bounds = array<i64: 1, 128>}, {pipeline_mode = #tpu.pipeline_mode<synchronous>, transform_indices = @transform_3, window_bounds = array<i64: 128, 512>}, {pipeline_mode = #tpu.pipeline_mode<synchronous>, transform_indices = @transform_4, window_bounds = array<i64: 1, 512>}, {pipeline_mode = #tpu.pipeline_mode<synchronous>, transform_indices = @transform_5, window_bounds = array<i64: 8, 512>}]} {
    %c0_i32 = arith.constant 0 : i32
    %0 = arith.cmpi eq, %arg0, %c0_i32 : i32
    %1 = arith.extui %0 : i1 to i32
    %c0_i32_0 = arith.constant 0 : i32
    %2 = arith.cmpi ne, %1, %c0_i32_0 : i32
    scf.if %2 {
      %cst = arith.constant 0.000000e+00 : f32
      %10 = vector.broadcast %cst : f32 to vector<8x128xf32>
      %c0_3 = arith.constant 0 : index
      %c0_4 = arith.constant 0 : index
      %11 = vector.load %arg9[%c0_3, %c0_4] : memref<8x128xf32, #tpu.memory_space<vmem>>, vector<8x128xf32>
      tpu.vector_store %arg9[%c0_3, %c0_4], %10 {strides = array<i32>} : memref<8x128xf32, #tpu.memory_space<vmem>>, vector<8x128xf32>,
    } else {
    }
    %c0 = arith.constant 0 : index
    %3 = memref.load %arg2[%c0] : memref<1xi32, #tpu.memory_space<smem>>
    %4 = arith.cmpi slt, %arg0, %3 : i32
    %5 = arith.extui %4 : i1 to i32
    %c0_i32_1 = arith.constant 0 : i32
    %6 = arith.cmpi ne, %5, %c0_i32_1 : i32
    scf.if %6 {
      %c0_3 = arith.constant 0 : index
      %c0_4 = arith.constant 0 : index
      %10 = vector.load %arg9[%c0_3, %c0_4] : memref<8x128xf32, #tpu.memory_space<vmem>>, vector<8x128xf32>
      %c0_5 = arith.constant 0 : index
      %c0_6 = arith.constant 0 : index
      %11 = vector.load %arg3[%c0_5, %c0_6] : memref<8x256xbf16, #tpu.memory_space<vmem>>, vector<8x256xbf16>
      %c0_7 = arith.constant 0 : index
      %c0_8 = arith.constant 0 : index
      %12 = vector.load %arg4[%c0_7, %c0_8] : memref<256x128xbf16, #tpu.memory_space<vmem>>, vector<256x128xbf16>
      %cst = arith.constant dense<0.000000e+00> : vector<8x128xf32>
      %13 = tpu.matmul %11, %12, %cst {dimension_numbers = #tpu.dot_dimension_numbers<[1], [0], [0], [1], [0, 0, 1, 1], [], []>} : vector<8x256xbf16>, vector<256x128xbf16>, vector<8x128xf32> -> vector<8x128xf32>
      %14 = arith.addf %10, %13 : vector<8x128xf32>
      %c0_9 = arith.constant 0 : index
      %c0_10 = arith.constant 0 : index
      %15 = vector.load %arg9[%c0_9, %c0_10] : memref<8x128xf32, #tpu.memory_space<vmem>>, vector<8x128xf32>
      tpu.vector_store %arg9[%c0_9, %c0_10], %14 {strides = array<i32>} : memref<8x128xf32, #tpu.memory_space<vmem>>, vector<8x128xf32>,
    } else {
    }
    %c3_i32 = arith.constant 3 : i32
    %7 = arith.cmpi eq, %arg0, %c3_i32 : i32
    %8 = arith.extui %7 : i1 to i32
    %c0_i32_2 = arith.constant 0 : i32
    %9 = arith.cmpi ne, %8, %c0_i32_2 : i32
    scf.if %9 {
      %c0_3 = arith.constant 0 : index
      %c0_4 = arith.constant 0 : index
      %10 = vector.load %arg9[%c0_3, %c0_4] : memref<8x128xf32, #tpu.memory_space<vmem>>, vector<8x128xf32>
      %c0_5 = arith.constant 0 : index
      %c0_6 = arith.constant 0 : index
      %11 = vector.load %arg5[%c0_5, %c0_6] : memref<1x128xf32, #tpu.memory_space<vmem>>, vector<1x128xf32>
      %12 = vector.broadcast %11 : vector<1x128xf32> to vector<8x128xf32>
      %13 = arith.addf %10, %12 : vector<8x128xf32>
      %14 = arith.truncf %13 : vector<8x128xf32> to vector<8x128xbf16>
      %c0_7 = arith.constant 0 : index
      %c0_8 = arith.constant 0 : index
      %15 = vector.load %arg6[%c0_7, %c0_8] : memref<128x512xbf16, #tpu.memory_space<vmem>>, vector<128x512xbf16>
      %cst = arith.constant dense<0.000000e+00> : vector<8x512xf32>
      %16 = tpu.matmul %14, %15, %cst {dimension_numbers = #tpu.dot_dimension_numbers<[1], [0], [0], [1], [0, 0, 1, 1], [], []>} : vector<8x128xbf16>, vector<128x512xbf16>, vector<8x512xf32> -> vector<8x512xf32>
      %c0_9 = arith.constant 0 : index
      %c0_10 = arith.constant 0 : index
      %17 = vector.load %arg7[%c0_9, %c0_10] : memref<1x512xf32, #tpu.memory_space<vmem>>, vector<1x512xf32>
      %18 = vector.broadcast %17 : vector<1x512xf32> to vector<8x512xf32>
      %19 = arith.addf %16, %18 : vector<8x512xf32>
      %c0_11 = arith.constant 0 : index
      %c0_12 = arith.constant 0 : index
      %20 = vector.load %arg8[%c0_11, %c0_12] : memref<8x512xf32, #tpu.memory_space<vmem>>, vector<8x512xf32>
      tpu.vector_store %arg8[%c0_11, %c0_12], %19 {strides = array<i32>} : memref<8x512xf32, #tpu.memory_space<vmem>>, vector<8x512xf32>,
    } else {
    }
    return
  }
  func.func @transform_0(%arg0: i32, %arg1: memref<4xi32, #tpu.memory_space<smem>>, %arg2: memref<1xi32, #tpu.memory_space<smem>>) -> (i32, i32) {
    %0 = arith.index_cast %arg0 : i32 to index
    %1 = memref.load %arg1[%0] : memref<4xi32, #tpu.memory_space<smem>>
    %c0_i32 = arith.constant 0 : i32
    %c0_i32_0 = arith.constant 0 : i32
    return %c0_i32, %1 : i32, i32
  }
  func.func @transform_1(%arg0: i32, %arg1: memref<4xi32, #tpu.memory_space<smem>>, %arg2: memref<1xi32, #tpu.memory_space<smem>>) -> (i32, i32) {
    %0 = arith.index_cast %arg0 : i32 to index
    %1 = memref.load %arg1[%0] : memref<4xi32, #tpu.memory_space<smem>>
    %c0_i32 = arith.constant 0 : i32
    %c0_i32_0 = arith.constant 0 : i32
    return %1, %c0_i32 : i32, i32
  }
  func.func @transform_2(%arg0: i32, %arg1: memref<4xi32, #tpu.memory_space<smem>>, %arg2: memref<1xi32, #tpu.memory_space<smem>>) -> (i32, i32) {
    %c0_i32 = arith.constant 0 : i32
    %c0_i32_0 = arith.constant 0 : i32
    %c0_i32_1 = arith.constant 0 : i32
    return %c0_i32, %c0_i32_0 : i32, i32
  }
  func.func @transform_3(%arg0: i32, %arg1: memref<4xi32, #tpu.memory_space<smem>>, %arg2: memref<1xi32, #tpu.memory_space<smem>>) -> (i32, i32) {
    %c0_i32 = arith.constant 0 : i32
    %c0_i32_0 = arith.constant 0 : i32
    %c0_i32_1 = arith.constant 0 : i32
    return %c0_i32, %c0_i32_0 : i32, i32
  }
  func.func @transform_4(%arg0: i32, %arg1: memref<4xi32, #tpu.memory_space<smem>>, %arg2: memref<1xi32, #tpu.memory_space<smem>>) -> (i32, i32) {
    %c0_i32 = arith.constant 0 : i32
    %c0_i32_0 = arith.constant 0 : i32
    %c0_i32_1 = arith.constant 0 : i32
    return %c0_i32, %c0_i32_0 : i32, i32
  }
  func.func @transform_5(%arg0: i32, %arg1: memref<4xi32, #tpu.memory_space<smem>>, %arg2: memref<1xi32, #tpu.memory_space<smem>>) -> (i32, i32) {
    %c0_i32 = arith.constant 0 : i32
    %c0_i32_0 = arith.constant 0 : i32
    %c0_i32_1 = arith.constant 0 : i32
    return %c0_i32, %c0_i32_0 : i32, i32
  }
}

</mosaic_0001>

<bundles_post_ra>
// kernel: tpu_custom_call.1
= control target key start
LH: loop header
LB: loop body
LE: loop exit
PB: predicated region body
PF: predicated region fallthrough
CT: control target
= control target key end

     0   :  { %s1736_s0 = inlined_call_operand.vmem [shape: s32[4], index: 0, kind: input, shape index: {}]   ;;  %s1737_s1 = inlined_call_operand.<no memory space> [shape: s32[1], index: 1, kind: input, shape index: {}]   ;;  %s1738_s2 = inlined_call_operand.hbm [shape: bf16[8,1024], index: 2, kind: input, shape index: {}]   ;;  %s1739_s3 = inlined_call_operand.hbm [shape: bf16[1024,128], index: 3, kind: input, shape index: {}]   ;;  %s1740_s4 = inlined_call_operand.vmem [shape: f32[1,128], index: 4, kind: input, shape index: {}]   ;;  %s1741_s5 = inlined_call_operand.hbm [shape: bf16[128,512], index: 5, kind: input, shape index: {}]   ;;  %s1742_s6 = inlined_call_operand.vmem [shape: f32[1,512], index: 6, kind: input, shape index: {}]   ;;  %s1743_s7 = inlined_call_operand.hbm [shape: f32[8,512], index: 7, kind: output, shape index: {}]  }
   0x1   :  { %1751 = sst [smem:[#allocation25_spill]] %s1741_s5  ;;  %s12_s26 = sshll.u32 %s1736_s0, 4  ;;  %s13_s26 = int_to_ptr.vmem [resolvable:$true] %s12_s26 }
   0x2   :  { %16 = sst [smem:[#allocation5]] %s1737_s1  ;;  %s1158_s29 = scalar_lea.vmem %s13_s26, 16 }
   0x3   :  { %p1159_p0 = scmp.ne.s32.totalorder %s13_s26, %s1158_s29  ;;  %p1163_p1 = scmp.lt.s32.totalorder %s13_s26, %s13_s26 }
   0x4   :  { %p1164_p2 = scmp.lt.s32.totalorder %s1158_s29, %s1158_s29 }
   0x6   :  { %p1165_p3 = por %p1164_p2, %p1163_p1 }
   0x8   :  { %p1166_p4 = pnand %p1165_p3, %p1159_p0 }
   0xa   :  { %1169 = shalt.err (!%p1166_p4)  }
   0xb   :  { %s1358_s30 = smov [#allocation4]  }
   0xc   :  { %15 = dma.vmem_to_smem %s13_s26, 16, %s1358_s30, [#allocation3] }
   0xd   :  { %1312 = dma.done.wait [#allocation3], 16 }
   0xe   :  { %1313 = vsyncadd [#allocation3], 4294967280 }
   0xf   :  { %18 = sfence }
  0x10   :  { %19 = vsyncpa [#allocation7], 0 }
  0x11   :  { %21 = vsyncpa [#allocation7 + $0x1], 0 }
  0x12   :  { %22 = vsyncpa [#allocation10], 0 }
  0x13   :  { %24 = vsyncpa [#allocation10 + $0x1], 0 }
  0x14   :  { %25 = vsyncpa [#allocation8], 0  ;;  %s1415_s0 = smov 0   ;;  %s1417_s1 = smov 0  }
  0x15   :  { %s1419_s8 = smov 0   ;;  %s1421_s9 = smov 0  }
  0x16   :  { %s1423_s10 = smov 0   ;;  %s1425_s11 = smov 0  }
  0x17   :  { %s1427_s12 = smov 0  }
  0x18 LB: > { %1752 = sst [smem:[#allocation22_spill]] %s1352_s11  ;;  %s1449_s13 = sadd.s32 4294967295, %s1356_s12   ;;  %s1356_s12 = sphi %s1427_s12, %s1783_s12   ;;  %s1352_s11 = sphi %s1425_s11, %s1776_s11   ;;  %s1348_s10 = sphi %s1423_s10, %s1782_s10   ;;  %s1344_s9 = sphi %s1421_s9, %s1781_s9   ;;  %s1340_s8 = sphi %s1419_s8, %s1780_s8   ;;  %s1336_s1 = sphi %s1417_s1, %s1779_s1   ;;  %s1332_s0 = sphi %s1415_s0, %s1778_s0  }
  0x19   : > { %p81_p5 = scmp.ne.s32.totalorder %s1336_s1, %s1332_s0  ;;  %p1744_p6 = scmp.eq.s32.totalorder %s1449_s13, 0 }
  0x1a   : > { %p896_p7 = scmp.ge.s32.totalorder %s1356_s12, 1  ;;  %p176_p8 = scmp.lt.s32.totalorder %s1356_s12, 5 }
  0x1b   : > { %p1458_p10 = por %p81_p5, %p1744_p6  ;;  %s1359_s16 = smov [#allocation11]  }
  0x1c   : > { %p1462_p11 = pnand %p896_p7, %p176_p8  ;;  %s191_s17 = sshll.u32 %s1359_s16, 4  ;;  %s192_s17 = int_to_ptr.vmem [resolvable:$true] %s191_s17 }
  0x1d   : > { %s1753_s14 = scalar_select %p1458_p10, 1, 0 }
  0x1e   : > { %s1754_s15 = scalar_select %p1462_p11, 1, 0 }
  0x1f   : > { %p1007_p12 = pneg %p1462_p11  ;;  %s1756_s5 = sld [smem:[#allocation25_spill]] }
  0x21   : > { %p1470_p13 = pnand %p1007_p12, %p1744_p6 }
  0x23   : > { %p1172_p1 = pneg %p1470_p13 }
  0x25   : > { %s1170_s21 = scalar_lea.hbm %s1756_s5, 4096 }
  0x26   : > { %p1171_p0 = scmp.ne.s32.totalorder %s1756_s5, %s1170_s21  ;;  %p1177_p4 = scmp.lt.u32.totalorder %s1170_s21, %s1756_s5 }
  0x28   : > { %p1173_p2 = pnand %p1172_p1, %p1171_p0 }
  0x2a   : > { %p1174_p3 = pneg %p1173_p2 }
  0x2c   : > { %p1179_p5 = pnand %p1177_p4, %p1174_p3 }
  0x2e   : > { %1182 = shalt.err (!%p1179_p5)
}
  0x2f   : > { %s1183_s26 = scalar_lea.vmem %s192_s17, 4096  ;;  %p1191_p9 = scmp.lt.s32.totalorder %s192_s17, %s192_s17 }
  0x30   : > { %p1184_p7 = scmp.ne.s32.totalorder %s192_s17, %s1183_s26  ;;  %p1192_p6 = scmp.lt.s32.totalorder %s1183_s26, %s1183_s26 }
  0x32   : > { %p1186_p8 = pnand %p1184_p7, %p1172_p1  ;;  %p1193_p10 = por %p1192_p6, %p1191_p9 }
  0x34   : > { %p1187_p12 = pneg %p1186_p8 }
  0x36   : > { %p1194_p11 = pnand %p1193_p10, %p1187_p12 }
  0x38   : > { %1197 = shalt.err (!%p1194_p11)
}
  0x39   : > { %s1360_s27 = smov 256   ;;  %s1361_s28 = smov 16  }
  0x3a   : > { %1010 = dma.hbm_to_vmem [thread:$0]  (!%p1470_p13), %s1756_s5, 4096, %s192_s17, [#allocation10], %s1360_s27, %s1360_s27, %s1361_s28  }
  0x3b   : > { %s1491_s0 = sadd.s32 1, %s1356_s12   ;;  %s35_s16 = sld [smem:[#allocation4 + %s1356_s12]] }
  0x3c   : > { %s36_s19 = sld [smem:[#allocation4 + %s1491_s0]]  ;;  %p47_p6 = scmp.ne.s32.totalorder %s1352_s11, %s1348_s10 }
  0x3d   : > { %p48_p9 = scmp.eq.s32.totalorder %s1356_s12, 0  ;;  %p53_p10 = scmp.ne.s32.totalorder %s1348_s10, %s1344_s9 }
  0x3e   : > { %s63_s20 = sld [smem:[#allocation4 + %s1356_s12]]  ;;  %s40_s21 = sadd.s32 1, %s1352_s11 }
  0x3f   : > { %s64_s18 = sld [smem:[#allocation4 + %s1491_s0]]  ;;  %p1757_p11 = scmp.eq.s32.totalorder %s1449_s13, 0 }
  0x40   : > { %p1511_p0 = por %p48_p9, %p47_p6  ;;  %p75_p1 = scmp.ne.s32.totalorder %s1340_s8, %s1336_s1 }
  0x41   : > { %p1505_p13 = por %p1757_p11, %p53_p10  ;;  %p1748_p2 = scmp.lt.s32.totalorder %s1356_s12, 4 }
  0x42   : > { %s37_s9 = ssub.s32 %s35_s16, %s36_s19  ;;  %s68_s23 = sadd.s32 1, %s1340_s8 }
  0x43   : > { %s1758_s17 = scalar_select %p1505_p13, 1, 0 }
  0x44   : > { %p38_p3 = scmp.eq.s32.totalorder %s37_s9, 0  ;;  %s208_s24 = sand.u32 1, %s1352_s11  }
  0x45   : > { %p1524_p4 = pnand %p1748_p2, %p1511_p0  ;;  %s65_s27 = ssub.s32 %s63_s20, %s64_s18 }
  0x46   : > { %s1529_s26 = scalar_select %p38_p3, %s1352_s11, %s40_s21  }
  0x47   : > { %p1533_p5 = por %p75_p1, %p48_p9  ;;  %p66_p7 = scmp.eq.s32.totalorder %s65_s27, 0 }
  0x48   : > { %1761 = sst [smem:[#allocation23_spill]] %s1529_s26  ;;  %s899_s29 = sshll.u32 %s208_s24, 3 }
  0x49   : > { %s1538_s30 = scalar_select %p66_p7, %s1340_s8, %s68_s23  }
  0x4a   : > { %s993_s16 = scalar_select %p1511_p0, [#allocation4], [#allocation13] }
  0x4b   : > { %1763 = sst [smem:[#allocation24_spill]] %s1538_s30  ;;  %p1553_p8 = pnand %p1748_p2, %p1533_p5 }
  0x4c   : > { %s994_s19 = scalar_select %p1511_p0, %s1356_s12, 0 }
  0x4d   : > { %s1785_s16 = smov (!%p1748_p2, %s993_s16), [#allocation15]  ;;  %s212_s21 = scalar_lea.vmem [#allocation6], %s899_s29 }
  0x4e   : > { %s1787_s19 = smov (!%p1748_p2, %s994_s19), 0  ;;  %s221_s9 = sshll.u32 %s212_s21, 4  ;;  %s1557_s9 = int_to_ptr.vmem [resolvable:$true] %s221_s9 }
  0x4f   : > { %s1764_s20 = scalar_select %p1553_p8, 1, 0 }
  0x50   : > { %s213_s18 = sld [smem:[%s1785_s16 + %s1787_s19]]  ;;  %s230_s23 = sand.u32 1, %s1340_s8  }
  0x51   : > { %s996_s22 = scalar_select %p1533_p5, [#allocation4], [#allocation14] }
  0x52   : > { %s1567_s30 = sshll.u32 %s230_s23, 7  ;;  %s209_s16 = scalar_lea.sflag [#allocation7], %s208_s24 }
  0x53   : > { %p1200_p6 = pneg %p1524_p4  ;;  %s1203_s5 = scalar_lea.hbm %s1738_s2, 512 }
  0x56   : > { %s967_s27 = sshll.u32 %s213_s18, 7 }
  0x57   : > { %s1565_s11 = scalar_lea.hbm %s1738_s2, %s967_s27 }
  0x58   : > { %s1198_s29 = scalar_lea.hbm %s1565_s11, 128  ;;  %p1204_p11 = scmp.lt.u32.totalorder %s1565_s11, %s1738_s2 }
  0x59   : > { %p1199_p12 = scmp.ne.s32.totalorder %s1565_s11, %s1198_s29  ;;  %p1205_p0 = scmp.lt.u32.totalorder %s1203_s5, %s1198_s29 }
  0x5a   : > { %p1207_p3 = scmp.lt.u32.totalorder %s1198_s29, %s1565_s11 }
  0x5b   : > { %p1201_p9 = pnand %p1200_p6, %p1199_p12  ;;  %p1206_p1 = por %p1205_p0, %p1204_p11 }
  0x5d   : > { %p1202_p10 = pneg %p1201_p9  ;;  %p1208_p7 = por %p1207_p3, %p1206_p1 }
  0x5f   : > { %p1209_p2 = pnand %p1208_p7, %p1202_p10 }
  0x61   : > { %1212 = shalt.err (!%p1209_p2)
}
  0x62   : > { %s1213_s24 = scalar_lea.vmem %s1557_s9, 128  ;;  %s1362_s23 = smov [#allocation6]  }
  0x63   : > { %p1214_p12 = scmp.ne.s32.totalorder %s1557_s9, %s1213_s24  ;;  %s1218_s27 = sshll.u32 %s1362_s23, 4  ;;  %s1219_s27 = int_to_ptr.vmem [resolvable:$false] %s1218_s27 }
  0x64   : > { %s1220_s19 = scalar_lea.vmem %s1219_s27, 256  ;;  %p1221_p8 = scmp.lt.s32.totalorder %s1557_s9, %s1219_s27 }
  0x65   : > { %p1216_p9 = pnand %p1214_p12, %p1200_p6  ;;  %p1222_p11 = scmp.lt.s32.totalorder %s1220_s19, %s1213_s24 }
  0x67   : > { %p1217_p13 = pneg %p1216_p9  ;;  %p1223_p0 = por %p1222_p11, %p1221_p8 }
  0x69   : > { %p1224_p1 = pnand %p1223_p0, %p1217_p13 }
  0x6b   : > { %1227 = shalt.err (!%p1224_p1)
}
  0x6c   : > { %1016 = dma.hbm_to_vmem [thread:$0]  (!%p1524_p4), %s1565_s11, 128, %s1557_s9, %s209_s16  }
  0x6d   : > { %s997_s29 = scalar_select %p1533_p5, %s1356_s12, 0 }
  0x6e   : > { %p1765_p13 = scmp.lt.s32.totalorder %s1356_s12, 4  ;;  %s228_s18 = sand.u32 1, %s1356_s12  }
  0x6f   : > { %s232_s5 = scalar_lea.vmem [#allocation9], %s1567_s30  ;;  %s1613_s11 = scalar_lea.sflag [#allocation10], %s228_s18 }
  0x70   : > { %s1789_s22 = smov (!%p1765_p13, %s996_s22), [#allocation16]  ;;  %p1766_p2 = pmov %p1765_p13 }
  0x71   : > { %s240_s26 = sshll.u32 %s232_s5, 4  ;;  %p1767_p5 = scmp.ne.s32.totalorder %s1764_s20, 0  ;;  %s1606_s26 = int_to_ptr.vmem [resolvable:$true] %s240_s26 }
  0x72   : > { %s1791_s29 = smov (!%p1766_p2, %s997_s29), 0  ;;  %s1233_s9 = scalar_lea.hbm %s1739_s3, 8192 }
  0x73   : > { %s233_s25 = sld [smem:[%s1789_s22 + %s1791_s29]]  ;;  %p1230_p8 = pneg %p1767_p5 }
  0x79   : > { %s968_s21 = sshll.u32 %s233_s25, 11 }
  0x7a   : > { %s1611_s27 = scalar_lea.hbm %s1739_s3, %s968_s21 }
  0x7b   : > { %s1228_s28 = scalar_lea.hbm %s1611_s27, 2048  ;;  %p1234_p3 = scmp.lt.u32.totalorder %s1611_s27, %s1739_s3 }
  0x7c   : > { %p1229_p4 = scmp.ne.s32.totalorder %s1611_s27, %s1228_s28  ;;  %p1235_p7 = scmp.lt.u32.totalorder %s1233_s9, %s1228_s28 }
  0x7d   : > { %p1237_p9 = scmp.lt.u32.totalorder %s1228_s28, %s1611_s27 }
  0x7e   : > { %p1231_p6 = pnand %p1230_p8, %p1229_p4  ;;  %p1236_p12 = por %p1235_p7, %p1234_p3 }
  0x80   : > { %p1232_p10 = pneg %p1231_p6  ;;  %p1238_p11 = por %p1237_p9, %p1236_p12 }
  0x82   : > { %p1239_p0 = pnand %p1238_p11, %p1232_p10 }
  0x84   : > { %1242 = shalt.err (!%p1239_p0)
}
  0x85   : > { %s1243_s19 = scalar_lea.vmem %s1606_s26, 2048  ;;  %s1363_s29 = smov [#allocation9]  }
  0x86   : > { %p1244_p1 = scmp.ne.s32.totalorder %s1606_s26, %s1243_s19  ;;  %s1248_s25 = sshll.u32 %s1363_s29, 4  ;;  %s1249_s25 = int_to_ptr.vmem [resolvable:$false] %s1248_s25 }
  0x87   : > { %s1250_s18 = scalar_lea.vmem %s1249_s25, 4096  ;;  %p1251_p4 = scmp.lt.s32.totalorder %s1606_s26, %s1249_s25 }
  0x88   : > { %p1246_p13 = pnand %p1244_p1, %p1230_p8  ;;  %p1252_p6 = scmp.lt.s32.totalorder %s1250_s18, %s1243_s19 }
  0x8a   : > { %p1247_p2 = pneg %p1246_p13  ;;  %p1253_p3 = por %p1252_p6, %p1251_p4 }
  0x8c   : > { %p1254_p7 = pnand %p1253_p3, %p1247_p2 }
  0x8e   : > { %1257 = shalt.err (!%p1254_p7)
}
  0x8f   : > { %s1364_s5 = smov 64   ;;  %s1365_s21 = smov 4  }
  0x90   : > { %1021 = dma.hbm_to_vmem [thread:$0]  (!%p1767_p5), %s1611_s27, 2048, %s1606_s26, %s1613_s11, %s1364_s5, %s1364_s5, %s1365_s21  }
  0x91   : > { %p1768_p8 = scmp.ne.s32.totalorder %s1754_s15, 0 }
  0x92   : > { %s254_s24 = sand.u32 (!%p1768_p8), 1, %s1348_s10   ;;  %p1769_p10 = scmp.ne.s32.totalorder (!%p1768_p8), %s1758_s17, 0 }
  0x93   : > { %252 = sbr.rel (%p1768_p8) target bundleno = 706 (0x2c2), region = 40  ;;  %s1644_s23 = sshll.u32 (!%p1768_p8), %s254_s24, 3 }
  0x94   : > { %s255_s28 = scalar_lea.sflag (!%p1768_p8), [#allocation7], %s254_s24  ;;  %s258_s12 = scalar_lea.vmem (!%p1768_p8), [#allocation6], %s1644_s23 }
  0x9a   : > { %1315 = dma.done.wait (%p1769_p10), %s255_s28, 128  }
  0x9b   : > { %1317 = vsyncadd (%p1769_p10), %s255_s28, 4294967168  ;;  %s263_s20 = sand.u32 1, %s1449_s13   ;;  %s265_s26 = sand.u32 1, %s1336_s1  }
  0x9c   : > { %s907_s15 = sshll.u32 %s265_s26, 7  ;;  %s264_s27 = scalar_lea.sflag [#allocation10], %s263_s20 }
  0x9d   : > { %s1653_s11 = scalar_lea.vmem [#allocation9], %s907_s15  ;;  %p1770_p5 = scmp.ne.s32.totalorder %s1753_s14, 0 }
  0x9f   : > { %1319 = dma.done.wait (%p1770_p5), %s264_s27, 2048  }
  0xa0   : > { %1321 = vsyncadd (%p1770_p5), %s264_s27, 4294965248  ;;  %p1771_p12 = scmp.eq.s32.totalorder %s1449_s13, 0 }
  0xa2   : > { %1323 = dma.done.wait (%p1771_p12), [#allocation10], 4096   ;;  %p1772_p9 = pmov %p1771_p12 }
  0xa3   : > { %p1773_p11 = scmp.ne.s32.totalorder %s1449_s13, 0 }
  0xa4   : > { %1325 = vsyncadd (%p1772_p9), [#allocation10], 4294963200  ;;  %v1366_v0 = vmov (!%p1773_p11), 0.0  }
  0xa5   : > { %306 = sbr.rel (%p1773_p11) target bundleno = 172 (0xac), region = 56  ;;  %307 = vst [vmem:[#allocation2] sm:$0xff] (!%p1773_p11), %v1366_v0 }
  0xac PF: > { %s308_s17 = sld [smem:[#allocation5]] }
  0xb2   : > { %p910_p0 = scmp.ge.s32.totalorder %s1449_s13, %s308_s17 }
  0xb3   : > { %v1092_v1 = vld [vmem:[%s1653_s11 + $0x40] sm:$0xff] (!%p910_p0)   ;;  %v1094_v3 = vld [vmem:[%s1653_s11 + $0x48] sm:$0xff] (!%p910_p0)   ;;  %v1096_v5 = vld [vmem:[%s1653_s11 + $0x50] sm:$0xff] (!%p910_p0)  }
  0xb4   : > { %312 = sbr.rel (%p910_p0) target bundleno = 430 (0x1ae), region = 60  ;;  %v1093_v2 = vld [vmem:[%s1653_s11] sm:$0xff] (!%p910_p0)   ;;  %969 = vmatprep.subr.bf16.mxu0 (!%p910_p0), %v1092_v1  ;;  %v1095_v4 = vld [vmem:[%s1653_s11 + $0x8] sm:$0xff] (!%p910_p0)   ;;  %v1097_v6 = vld [vmem:[%s1653_s11 + $0x10] sm:$0xff] (!%p910_p0)  }
  0xb5   : > { %970 = vmatpush3.bf16.msra.mxu0 (!%p910_p0), %v1093_v2  ;;  %v1098_v7 = vld [vmem:[%s1653_s11 + $0x58] sm:$0xff] (!%p910_p0)   ;;  %v1100_v9 = vld [vmem:[%s1653_s11 + $0x60] sm:$0xff] (!%p910_p0)   ;;  %v1102_v11 = vld [vmem:[%s1653_s11 + $0x68] sm:$0xff] (!%p910_p0)  }
  0xb6   : > { %971 = vmatprep.subr.bf16.mxu0 (!%p910_p0), %v1094_v3  ;;  %v1099_v8 = vld [vmem:[%s1653_s11 + $0x18] sm:$0xff] (!%p910_p0)   ;;  %v1101_v10 = vld [vmem:[%s1653_s11 + $0x20] sm:$0xff] (!%p910_p0)   ;;  %v1103_v14 = vld [vmem:[%s1653_s11 + $0x28] sm:$0xff] (!%p910_p0)  }
  0xb7   : > { %v314_v12 = vld [vmem:[%s258_s12] sm:$0xff] (!%p910_p0)  ;;  %v313_v21 = vld [vmem:[#allocation2] sm:$0xff] (!%p910_p0) }
  0xb8   : > { %v912_v13 = vcombine.high (!%p910_p0), %v314_v12, %v314_v12  ;;  %v1104_v15 = vld [vmem:[%s1653_s11 + $0x70] sm:$0xff] (!%p910_p0)   ;;  %v1106_v17 = vld [vmem:[%s1653_s11 + $0x78] sm:$0xff] (!%p910_p0)   ;;  %v911_v19 = vcombine.low (!%p910_p0), %v314_v12, %v314_v12 }
  0xb9   : > { %972 = vmatpush3.bf16.msra.mxu0 (!%p910_p0), %v1095_v4  ;;  %v1105_v16 = vld [vmem:[%s1653_s11 + $0x30] sm:$0xff] (!%p910_p0)   ;;  %v1107_v18 = vld [vmem:[%s1653_s11 + $0x38] sm:$0xff] (!%p910_p0)  }
  0xba   : > { %973 = vmatprep.subr.bf16.mxu0 (!%p910_p0), %v1096_v5  ;;  %482 = vmatprep.mubr.bf16.mxu0 (!%p910_p0), %v912_v13 }
  0xbd   : > { %974 = vmatpush3.bf16.msra.mxu0 %v1097_v6 }
  0xbe   : > { %975 = vmatprep.subr.bf16.mxu0 %v1098_v7 }
  0xc1   : > { %976 = vmatpush3.bf16.msra.mxu0 %v1099_v8 }
  0xc2   : > { %977 = vmatprep.subr.bf16.mxu0 %v1100_v9 }
  0xc5   : > { %978 = vmatpush3.bf16.msra.mxu0 %v1101_v10 }
  0xc6   : > { %979 = vmatprep.subr.bf16.mxu0 %v1102_v11 }
  0xc9   : > { %980 = vmatpush3.bf16.msra.mxu0 %v1103_v14 }
  0xca   : > { %981 = vmatprep.subr.bf16.mxu0 %v1104_v15 }
  0xcd   : > { %982 = vmatpush3.bf16.msra.mxu0 %v1105_v16 }
  0xce   : > { %983 = vmatprep.subr.bf16.mxu0 %v1106_v17 }
  0xd1   : > { %984 = vmatpush3.bf16.msra.mxu0 %v1107_v18 }
  0xd4   : > { %483 = vmatmul.mubr.bf16.vlgmr.msra.gmra.mrb[0].mxu0 %v911_v19 }
 0x1a7   : > { %v985_v20 = vpop.f32.mrb[0].mxu0 }
 0x1a8   : > { %v986_v22 = vpop.f32.mrb[1].mxu0 }
 0x1a9   : > { %v987_v23 = vadd.f32 %v986_v22, %v985_v20  ;;  %v988_v24 = vpop.f32.mrb[2].mxu0 }
 0x1aa   : > { %v989_v25 = vpop.f32.mrb[3].mxu0 }
 0x1ab   : > { %v490_v26 = vadd.f32 %v987_v23, %v313_v21 }
 0x1ad   : > { %491 = vst [vmem:[#allocation2] sm:$0xff] %v490_v26 }
 0x1ae PF: > { %p929_p1 = scmp.ne.s32.totalorder %s1449_s13, 3 }
 0x1af   : > { %v1110_v27 = vld [vmem:[#allocation11 + $0x4] ss:$16 sps:$4 sm:$0xff] (!%p929_p1)   ;;  %v1112_v28 = vld [vmem:[#allocation11 + $0xc] ss:$16 sps:$4 sm:$0xff] (!%p929_p1)   ;;  %v1367_v29 = vmov (!%p929_p1), 0   ;;  %v540_v0 = vlaneseq (!%p929_p1) }
 0x1b0   : > { %495 = sbr.rel (%p929_p1) target bundleno = 681 (0x2a9), region = 64  ;;  %752 = vmatprep.mubr.bf16.mxu0 (!%p929_p1), %v1367_v29  ;;  %793 = vmatprep.mubr.bf16.mxu1 (!%p929_p1), %v1367_v29  ;;  %v1114_v30 = vld [vmem:[#allocation11] ss:$16 sps:$4 sm:$0xff] (!%p929_p1)   ;;  %v1115_v31 = vld [vmem:[#allocation11 + $0x8] ss:$16 sps:$4 sm:$0xff] (!%p929_p1)  }
 0x1b1   : > { %720 = vmatprep.subr.bf16.mxu0 (!%p929_p1), %v1110_v27  ;;  %761 = vmatprep.subr.bf16.mxu1 (!%p929_p1), %v1112_v28  ;;  %v1116_v32 = vld [vmem:[#allocation11 + $0x24] ss:$16 sps:$4 sm:$0xff] (!%p929_p1)   ;;  %v1118_v33 = vld [vmem:[#allocation11 + $0x2c] ss:$16 sps:$4 sm:$0xff] (!%p929_p1)   ;;  %v1120_v34 = vld [vmem:[#allocation11 + $0x20] ss:$16 sps:$4 sm:$0xff] (!%p929_p1)  }
 0x1b2   : > { %721 = vmatpush1.bf16.msra.mxu0 (!%p929_p1), %v1114_v30  ;;  %762 = vmatpush1.bf16.msra.mxu1 (!%p929_p1), %v1115_v31  ;;  %v1121_v35 = vld [vmem:[#allocation11 + $0x28] ss:$16 sps:$4 sm:$0xff] (!%p929_p1)   ;;  %v1122_v36 = vld [vmem:[#allocation11 + $0x44] ss:$16 sps:$4 sm:$0xff] (!%p929_p1)   ;;  %v1124_v37 = vld [vmem:[#allocation11 + $0x4c] ss:$16 sps:$4 sm:$0xff] (!%p929_p1)  }
 0x1b3   : > { %722 = vmatprep.subr.bf16.mxu0 (!%p929_p1), %v1116_v32  ;;  %763 = vmatprep.subr.bf16.mxu1 (!%p929_p1), %v1118_v33  ;;  %v1126_v38 = vld [vmem:[#allocation11 + $0x40] ss:$16 sps:$4 sm:$0xff] (!%p929_p1)   ;;  %v1127_v39 = vld [vmem:[#allocation11 + $0x48] ss:$16 sps:$4 sm:$0xff] (!%p929_p1)   ;;  %v1128_v40 = vld [vmem:[#allocation11 + $0x64] ss:$16 sps:$4 sm:$0xff] (!%p929_p1)  }
 0x1b4   : > { %v1130_v41 = vld [vmem:[#allocation11 + $0x6c] ss:$16 sps:$4 sm:$0xff] (!%p929_p1)   ;;  %v1132_v42 = vld [vmem:[#allocation11 + $0x60] ss:$16 sps:$4 sm:$0xff] (!%p929_p1)   ;;  %v1133_v43 = vld [vmem:[#allocation11 + $0x68] ss:$16 sps:$4 sm:$0xff] (!%p929_p1)  }
 0x1b5   : > { %v1134_v44 = vld [vmem:[#allocation11 + $0x84] ss:$16 sps:$4 sm:$0xff] (!%p929_p1)   ;;  %v1136_v45 = vld [vmem:[#allocation11 + $0x8c] ss:$16 sps:$4 sm:$0xff] (!%p929_p1)   ;;  %v1138_v46 = vld [vmem:[#allocation11 + $0x80] ss:$16 sps:$4 sm:$0xff] (!%p929_p1)  }
 0x1b6   : > { %723 = vmatpush1.bf16.msra.mxu0 (!%p929_p1), %v1120_v34  ;;  %764 = vmatpush1.bf16.msra.mxu1 (!%p929_p1), %v1121_v35  ;;  %v1139_v47 = vld [vmem:[#allocation11 + $0x88] ss:$16 sps:$4 sm:$0xff] (!%p929_p1)   ;;  %v1140_v48 = vld [vmem:[#allocation11 + $0xa4] ss:$16 sps:$4 sm:$0xff] (!%p929_p1)   ;;  %v1142_v49 = vld [vmem:[#allocation11 + $0xac] ss:$16 sps:$4 sm:$0xff] (!%p929_p1)  }
 0x1b7   : > { %724 = vmatprep.subr.bf16.mxu0 %v1122_v36  ;;  %765 = vmatprep.subr.bf16.mxu1 %v1124_v37  ;;  %v1144_v50 = vld [vmem:[#allocation11 + $0xa0] ss:$16 sps:$4 sm:$0xff]   ;;  %v1145_v51 = vld [vmem:[#allocation11 + $0xa8] ss:$16 sps:$4 sm:$0xff]   ;;  %v1146_v52 = vld [vmem:[#allocation11 + $0xc4] ss:$16 sps:$4 sm:$0xff]  }
 0x1b8   : > { %v1148_v53 = vld [vmem:[#allocation11 + $0xcc] ss:$16 sps:$4 sm:$0xff]   ;;  %v1150_v54 = vld [vmem:[#allocation11 + $0xc0] ss:$16 sps:$4 sm:$0xff]   ;;  %v1151_v55 = vld [vmem:[#allocation11 + $0xc8] ss:$16 sps:$4 sm:$0xff]  }
 0x1b9   : > { %v496_v56 = vld [vmem:[#allocation2] sm:$0xff]  ;;  %v1152_v58 = vld [vmem:[#allocation11 + $0xe4] ss:$16 sps:$4 sm:$0xff]   ;;  %v1156_v61 = vld [vmem:[#allocation11 + $0xe0] ss:$16 sps:$4 sm:$0xff]   ;;  %v541_v1 = vshrl.u32 %v540_v0, 7 }
 0x1ba   : > { %725 = vmatpush1.bf16.msra.mxu0 %v1126_v38  ;;  %766 = vmatpush1.bf16.msra.mxu1 %v1127_v39  ;;  %v930_v57 = vld [vmem:[%s1740_s4] ss:$0 sm:$0xff]  ;;  %v1154_v59 = vld [vmem:[#allocation11 + $0xec] ss:$16 sps:$4 sm:$0xff]  }
 0x1bb   : > { %726 = vmatprep.subr.bf16.mxu0 %v1128_v40  ;;  %767 = vmatprep.subr.bf16.mxu1 %v1130_v41  ;;  %v504_v60 = vadd.f32 %v930_v57, %v496_v56  ;;  %v1157_v62 = vld [vmem:[#allocation11 + $0xe8] ss:$16 sps:$4 sm:$0xff]   ;;  %v542_v2 = vsub.s32 0, %v541_v1  ;;  %v550_v3 = vsub.s32 2, %v541_v1  ;;  %v546_v5 = vsub.s32 1, %v541_v1 }
 0x1bc   : > { %v538_v4 = vld [vmem:[%s1742_s6] sm:$0xf]  ;;  %v554_v6 = vsub.s32 3, %v541_v1 }
 0x1bd   : > { %v505_v63 = vpack.c.bf16 %v504_v60, %v504_v60  ;;  %v543_v7 = vrot.slane %v538_v4, %v542_v2  ;;  %v551_v8 = vrot.slane %v538_v4, %v550_v3  ;;  %v547_v9 = vrot.slane %v538_v4, %v546_v5 }
 0x1be   : > { %727 = vmatpush1.bf16.msra.mxu0 %v1132_v42  ;;  %768 = vmatpush1.bf16.msra.mxu1 %v1133_v43  ;;  %v555_v10 = vrot.slane %v538_v4, %v554_v6 }
 0x1bf   : > { %728 = vmatprep.subr.bf16.mxu0 %v1134_v44  ;;  %769 = vmatprep.subr.bf16.mxu1 %v1136_v45 }
 0x1c2   : > { %729 = vmatpush1.bf16.msra.mxu0 %v1138_v46  ;;  %770 = vmatpush1.bf16.msra.mxu1 %v1139_v47 }
 0x1c3   : > { %730 = vmatprep.subr.bf16.mxu0 %v1140_v48  ;;  %771 = vmatprep.subr.bf16.mxu1 %v1142_v49 }
 0x1c6   : > { %731 = vmatpush1.bf16.msra.mxu0 %v1144_v50  ;;  %772 = vmatpush1.bf16.msra.mxu1 %v1145_v51 }
 0x1c7   : > { %732 = vmatprep.subr.bf16.mxu0 %v1146_v52  ;;  %773 = vmatprep.subr.bf16.mxu1 %v1148_v53 }
 0x1ca   : > { %733 = vmatpush1.bf16.msra.mxu0 %v1150_v54  ;;  %774 = vmatpush1.bf16.msra.mxu1 %v1151_v55 }
 0x1cb   : > { %734 = vmatprep.subr.bf16.mxu0 %v1152_v58  ;;  %775 = vmatprep.subr.bf16.mxu1 %v1154_v59 }
 0x1ce   : > { %735 = vmatpush1.bf16.msra.mxu0 %v1156_v61  ;;  %776 = vmatpush1.bf16.msra.mxu1 %v1157_v62 }
 0x1d1   : > { %753 = vmatmul.mubr.bf16.vlgmr.msra.gmra.mrb[0].mxu0 %v505_v63  ;;  %794 = vmatmul.mubr.bf16.vlgmr.msra.gmra.mrb[0].mxu1 %v505_v63 }
 0x2a4   : > { %v754_v11 = vpop.f32.mrb[0].mxu0  ;;  %v795_v12 = vpop.f32.mrb[0].mxu1 }
 0x2a5   : > { %v755_v13 = vadd.f32 %v754_v11, %v543_v7  ;;  %v796_v14 = vadd.f32 %v795_v12, %v551_v8  ;;  %v756_v15 = vpop.f32.mrb[1].mxu0  ;;  %v797_v16 = vpop.f32.mrb[1].mxu1 }
 0x2a6   : > { %v757_v17 = vadd.f32 %v756_v15, %v547_v9  ;;  %v798_v18 = vadd.f32 %v797_v16, %v555_v10  ;;  %v758_v19 = vpop.f32.mrb[2].mxu0  ;;  %v799_v20 = vpop.f32.mrb[2].mxu1 }
 0x2a7   : > { %802 = vst [vmem:[#allocation12] sm:$0xff] %v755_v13  ;;  %804 = vst [vmem:[#allocation12 + $0x10] sm:$0xff] %v796_v14  ;;  %v759_v21 = vpop.f32.mrb[3].mxu0  ;;  %v800_v22 = vpop.f32.mrb[3].mxu1 }
 0x2a8   : > { %803 = vst [vmem:[#allocation12 + $0x8] sm:$0xff] %v757_v17  ;;  %805 = vst [vmem:[#allocation12 + $0x18] sm:$0xff] %v798_v18 }
 0x2a9 PF: > { %p1025_p13 = scmp.eq.s32.totalorder %s1449_s13, 3  ;;  %s1368_s16 = smov [#allocation12]  }
 0x2aa   : > { %s813_s19 = sshll.u32 %s1368_s16, 4  ;;  %s814_s19 = int_to_ptr.vmem [resolvable:$true] %s813_s19 }
 0x2ab   : > { %s1258_s29 = scalar_lea.vmem %s814_s19, 512  ;;  %p1265_p3 = scmp.lt.s32.totalorder %s814_s19, %s814_s19 }
 0x2ac   : > { %p1259_p2 = scmp.ne.s32.totalorder %s814_s19, %s1258_s29  ;;  %p1266_p7 = scmp.lt.s32.totalorder %s1258_s29, %s1258_s29 }
 0x2ae   : > { %p1260_p4 = pnand %p1259_p2, %p1025_p13  ;;  %p1267_p8 = por %p1266_p7, %p1265_p3 }
 0x2b0   : > { %p1261_p6 = pneg %p1260_p4 }
 0x2b2   : > { %p1268_p10 = pnand %p1267_p8, %p1261_p6 }
 0x2b4   : > { %1271 = shalt.err (!%p1268_p10)
}
 0x2b5   : > { %s1272_s5 = scalar_lea.hbm %s1743_s7, 512 }
 0x2b6   : > { %p1273_p5 = scmp.ne.s32.totalorder %s1743_s7, %s1272_s5  ;;  %p1278_p11 = scmp.lt.u32.totalorder %s1272_s5, %s1743_s7 }
 0x2b8   : > { %p1274_p12 = pnand %p1273_p5, %p1025_p13 }
 0x2ba   : > { %p1275_p9 = pneg %p1274_p12 }
 0x2bc   : > { %p1280_p0 = pnand %p1278_p11, %p1275_p9 }
 0x2be   : > { %1283 = shalt.err (!%p1280_p0)
}
 0x2bf   : > { %1004 = dma.vmem_to_hbm [thread:$0]  (%p1025_p13), %s814_s19, 512, %s1743_s7, [#allocation8]  }
 0x2c0   : > { %1327 = dma.done.wait (%p1025_p13), [#allocation8], 512  }
 0x2c1   : > { %1329 = vsyncadd (%p1025_p13), [#allocation8], 4294966784 }
 0x2c2 PF: > { %s1774_s26 = sld [smem:[#allocation24_spill]]  ;;  %s1775_s15 = sld [smem:[#allocation22_spill]] }
 0x2c3   : > { %s1776_s11 = sld [smem:[#allocation23_spill]]  ;;  %s1777_s27 = smov %s1491_s0 }
 0x2c4   : > { %p28_p1 = scmp.ge.s32.totalorder %s1491_s0, 6   ;;  %s1778_s0 = smov %s1336_s1 }
 0x2c5   : > { %s1779_s1 = smov %s1340_s8  ;;  %s1781_s9 = smov %s1348_s10 }
 0x2c6   : > { %s1783_s12 = smov %s1777_s27  ;;  %30 = sbr.rel (!%p28_p1) target bundleno = 24 (0x18), region = 106 }
 0x2c8   : > { %s1780_s8 = smov %s1774_s26  ;;  %s1782_s10 = smov %s1775_s15 }
 0x2cd   :  { %826 = vsyncpa [#allocation7], 1 }
 0x2ce   :  { %828 = vsyncpa [#allocation7 + $0x1], 1 }
 0x2cf   :  { %829 = vsyncpa [#allocation10], 1 }
 0x2d0   :  { %831 = vsyncpa [#allocation10 + $0x1], 1 }
 0x2d1   :  { %832 = vsyncpa [#allocation8], 1 }
 0x2d2   :  { %834 = vsyncpa [#allocation8 + $0x1], 1 }

</bundles_post_ra>
